<compile_context>
chip_gen: v5e
topology: v5e:2x2
jax: 0.10.0
libtpu: 0.0.40
codegen_flags: <defaults>
</compile_context>

<pallas_src>
import math
from functools import partial

import jax
import jax.numpy as jnp
from jax import lax
from jax.experimental import pallas as pl
from jax.experimental.pallas import tpu as pltpu


def autopad(k, p=None, d=1):
    if d > 1:
        k = d * (k - 1) + 1 if isinstance(k, int) else [d * (x - 1) + 1 for x in k]
    if p is None:
        p = k // 2 if isinstance(k, int) else [x // 2 for x in k]
    return p


def _round_up(x, m):
    return (x + m - 1) // m * m


# ----------------------------- Pallas kernel --------------------------------
def _mm_bias_silu_kernel(a_ref, b_ref, bias_ref, o_ref, acc_ref):
    # a_ref:    (tm, tk)   bf16 im2col patch tile
    # b_ref:    (tk, tn)   bf16 weight tile (BN scale already folded in)
    # bias_ref: (1, tn)    f32 folded BN bias
    # o_ref:    (tm, tn)   f32 output tile
    # acc_ref:  (tm, tn)   f32 VMEM accumulator (resident across K axis)
    @pl.when(pl.program_id(2) == 0)
    def _init():
        acc_ref[...] = jnp.zeros_like(acc_ref)

    acc_ref[...] += jnp.dot(a_ref[...], b_ref[...],
                            preferred_element_type=jnp.float32)

    @pl.when(pl.program_id(2) == pl.num_programs(2) - 1)
    def _finalize():
        y = acc_ref[...] + bias_ref[...]
        o_ref[...] = (y * jax.nn.sigmoid(y)).astype(o_ref.dtype)   # SiLU


def _matmul_bias_silu(a, b, bias, *, tm, tn, tk):
    Mp, Kp = a.shape
    _, C2p = b.shape
    grid = (Mp // tm, C2p // tn, Kp // tk)

    # VMEM working set: double-buffered input/output blocks + f32 accumulator.
    vmem_needed = 2 * (tm * tk * a.dtype.itemsize
                       + tk * tn * b.dtype.itemsize
                       + tn * 4
                       + tm * tn * 4) + tm * tn * 4
    vmem_limit = int(min(max(2 * vmem_needed, 16 * 2**20), 64 * 2**20))

    cost = pl.CostEstimate(
        flops=2 * Mp * Kp * C2p,
        transcendentals=Mp * C2p,  # sigmoid in the epilogue
        bytes_accessed=(Mp * Kp * a.dtype.itemsize
                        + Kp * C2p * b.dtype.itemsize
                        + C2p * 4
                        + Mp * C2p * 4),
    )

    return pl.pallas_call(
        _mm_bias_silu_kernel,
        out_shape=jax.ShapeDtypeStruct((Mp, C2p), jnp.float32),
        grid_spec=pltpu.PrefetchScalarGridSpec(
            num_scalar_prefetch=0,
            grid=grid,
            in_specs=[
                pl.BlockSpec((tm, tk), lambda i, j, kk: (i, kk)),
                pl.BlockSpec((tk, tn), lambda i, j, kk: (kk, j)),
                pl.BlockSpec((1, tn), lambda i, j, kk: (0, j)),
            ],
            out_specs=pl.BlockSpec((tm, tn), lambda i, j, kk: (i, j)),
            scratch_shapes=[pltpu.VMEM((tm, tn), jnp.float32)],
        ),
        compiler_params=pltpu.CompilerParams(
            dimension_semantics=("parallel", "parallel", "arbitrary"),
            vmem_limit_bytes=vmem_limit,
        ),
        cost_estimate=cost,
    )(a, b, bias)


# ------------------------------- forward --------------------------------------
@partial(jax.jit, static_argnames=("k", "s", "p"))
def conv_bn_silu_forward(x_nchw, weight, gamma, beta, mean, var, *, k, s, p,
                         eps=1e-5):
    N, C1, H, W = x_nchw.shape
    C2 = weight.shape[0]
    OH = (H + 2 * p - k) // s + 1
    OW = (W + 2 * p - k) // s + 1

    # Fold BN (inference) into the conv weight and a per-channel bias.
    scale = gamma / jnp.sqrt(var + eps)                      # (C2,)
    bias = (beta - mean * scale).reshape(1, C2)              # (1, C2)
    w_folded = weight * scale[:, None, None, None]           # (C2, C1, k, k)

    # ---- glue: NCHW -> NHWC, cast to bf16 (halves im2col HBM bytes), pad, im2col
    # TODO(synk): keep activations NHWC end-to-end across a layer stack instead of
    # converting NCHW<->NHWC per layer.
    x = jnp.transpose(x_nchw, (0, 2, 3, 1)).astype(jnp.bfloat16)
    x = jnp.pad(x, ((0, 0), (p, p), (p, p), (0, 0)))
    patches = []
    for kh in range(k):
        for kw in range(k):
            patches.append(x[:, kh:kh + OH * s:s, kw:kw + OW * s:s, :])
    # A: (M, K) with patch channel order (kh, kw, c1)
    a = jnp.concatenate(patches, axis=-1).reshape(N * OH * OW, k * k * C1)
    # TODO(synk): for large layers, fuse the im2col into the kernel (halo DMA into
    # VMEM scratch / shifted-window BlockSpecs) to avoid the k*k-duplicated HBM
    # patch matrix.

    # B: (K, C2) matching the (kh, kw, c1) ordering above, BN scale folded in.
    b = jnp.transpose(w_folded, (2, 3, 1, 0)).reshape(k * k * C1, C2)

    # ---- tiling choices -------------------------------------------------------
    M, K = a.shape
    C2p = _round_up(C2, 128)                 # lane-dense output / full MXU width
    tn = 256 if (C2p % 256 == 0) else 128    # 256-multiples preferred on v6e/v7x

    if M >= 1024:
        tm = 512
    elif M >= 512:
        tm = 256                             # keep >=2 M steps for v7x's 2 TCs
    else:
        tm = 128
    Mp = _round_up(M, tm)

    if K > 1024:                             # K-reduction tiling for big layers
        tk = 512
        Kp = _round_up(K, tk)
    else:
        tk, Kp = K, K

    # ---- zero-pad operands to the tiled shapes (bf16 operands, f32 bias) ------
    if Mp > M or Kp > K:
        a = jnp.pad(a, ((0, Mp - M), (0, Kp - K)))
    b = jnp.pad(b, ((0, Kp - K), (0, C2p - C2))).astype(jnp.bfloat16)
    bias = jnp.pad(bias, ((0, 0), (0, C2p - C2)))

    # ---- hot path: matmul + bias + SiLU in Pallas -----------------------------
    out = _matmul_bias_silu(a, b, bias, tm=tm, tn=tn, tk=tk)   # (Mp, C2p) f32

    # ---- glue: strip padding, back to NCHW ------------------------------------
    out = out[:M, :C2].reshape(N, OH, OW, C2)
    return jnp.transpose(out, (0, 3, 1, 2))


# ------------------------------- Conv module ---------------------------------
class ConvPallas:
    """Equivalent of the PyTorch `Conv` module (g=1, d=1, act=True, BN eval mode)."""

    # TODO(synk): groups>1 and dilation>1 paths not implemented (module defaults
    # are g=1, d=1); BN training-mode statistics update not implemented.

    def __init__(self, c1, c2, k=1, s=1, p=None, key=jax.random.PRNGKey(0)):
        self.c1, self.c2, self.k, self.s = c1, c2, k, s
        self.p = autopad(k, p, 1)

        kw, kb, kg, km, kv = jax.random.split(key, 5)
        fan_in = c1 * k * k
        bound = 1.0 / math.sqrt(fan_in)
        self.weight = jax.random.uniform(
            kw, (c2, c1, k, k), jnp.float32, -bound, bound)
        self.gamma = 1.0 + 0.1 * jax.random.normal(kg, (c2,), jnp.float32)
        self.beta = 0.1 * jax.random.normal(kb, (c2,), jnp.float32)
        self.running_mean = 0.1 * jax.random.normal(km, (c2,), jnp.float32)
        self.running_var = jnp.abs(
            1.0 + 0.1 * jax.random.normal(kv, (c2,), jnp.float32))
        self.eps = 1e-5

    def __call__(self, x_nchw):
        return conv_bn_silu_forward(
            x_nchw, self.weight, self.gamma, self.beta,
            self.running_mean, self.running_var,
            k=self.k, s=self.s, p=self.p, eps=self.eps)


# --------------------------------- references ---------------------------------
def _reference_matched(x_nchw, mod: ConvPallas):
    """Same math / same bf16 operand rounding as the kernel (tight tolerance)."""
    scale = mod.gamma / jnp.sqrt(mod.running_var + mod.eps)
    w_f = (mod.weight * scale[:, None, None, None]).astype(jnp.bfloat16).astype(jnp.float32)
    xb = x_nchw.astype(jnp.bfloat16).astype(jnp.float32)
    y = lax.conv_general_dilated(
        xb, w_f, window_strides=(mod.s, mod.s),
        padding=[(mod.p, mod.p), (mod.p, mod.p)],
        dimension_numbers=("NCHW", "OIHW", "NCHW"),
        precision=lax.Precision.HIGHEST)
    bias = (mod.beta - mod.running_mean * scale).reshape(1, -1, 1, 1)
    y = y + bias
    return y * jax.nn.sigmoid(y)


def _reference_fp32(x_nchw, mod: ConvPallas):
    """Pure f32 conv -> BN(eval) -> SiLU (module semantics, loose tolerance)."""
    y = lax.conv_general_dilated(
        x_nchw.astype(jnp.float32), mod.weight,
        window_strides=(mod.s, mod.s),
        padding=[(mod.p, mod.p), (mod.p, mod.p)],
        dimension_numbers=("NCHW", "OIHW", "NCHW"),
        precision=lax.Precision.HIGHEST)
    scale = (mod.gamma / jnp.sqrt(mod.running_var + mod.eps)).reshape(1, -1, 1, 1)
    bias = (mod.beta - mod.running_mean * scale[0, :, 0, 0]).reshape(1, -1, 1, 1)
    y = y * scale + bias
    return y * jax.nn.sigmoid(y)


if __name__ == "__main__":
    key = jax.random.PRNGKey(0)
    kx, kp = jax.random.split(key)

    # Small YOLO-like Conv: c1=4, c2=8, k=3, s=1 (autopad -> p=1)
    N, C1, H, W = 2, 4, 16, 16
    C2, K, S = 8, 3, 1

    x = jax.random.normal(kx, (N, C1, H, W), jnp.float32)
    conv = ConvPallas(C1, C2, k=K, s=S, key=kp)

    out = jax.block_until_ready(conv(x))
    assert out.shape == (N, C2, H, W)

    ref_m = jax.block_until_ready(_reference_matched(x, conv))
    ref_f = jax.block_until_ready(_reference_fp32(x, conv))
    assert jnp.allclose(out, ref_m, atol=1e-3, rtol=1e-3), \
        "mismatch vs matched-precision (bf16-operand) reference"
    assert jnp.allclose(out, ref_f, atol=6e-2, rtol=6e-2), \
        "mismatch vs f32 module reference"

    print("KERNEL_OK")
</pallas_src>

<mosaic_0001>
module attributes {stable_mosaic.version = 11 : i64} {
  func.func @_mm_bias_silu_kernel(%arg0: i32, %arg1: i32, %arg2: i32, %arg3: memref<256x36xbf16, #tpu.memory_space<vmem>>, %arg4: memref<36x128xbf16, #tpu.memory_space<vmem>>, %arg5: memref<1x128xf32, #tpu.memory_space<vmem>>, %arg6: memref<256x128xf32, #tpu.memory_space<vmem>>, %arg7: memref<256x128xf32, #tpu.memory_space<vmem>>) attributes {dimension_semantics = [#tpu.dimension_semantics<parallel>, #tpu.dimension_semantics<parallel>, #tpu.dimension_semantics<arbitrary>], iteration_bounds = array<i64: 2, 1, 1>, scalar_prefetch = 0 : i64, scratch_operands = 1 : i64, tpu.core_type = #tpu.core_type<tc>, window_params = [{transform_indices = @transform_0, window_bounds = array<i64: 256, 36>}, {transform_indices = @transform_1, window_bounds = array<i64: 36, 128>}, {transform_indices = @transform_2, window_bounds = array<i64: 1, 128>}, {transform_indices = @transform_3, window_bounds = array<i64: 256, 128>}]} {
    %c0_i32 = arith.constant 0 : i32
    %0 = arith.cmpi eq, %arg2, %c0_i32 : i32
    %1 = arith.extui %0 : i1 to i32
    %c0_i32_0 = arith.constant 0 : i32
    %2 = arith.cmpi ne, %1, %c0_i32_0 : i32
    scf.if %2 {
      %cst_10 = arith.constant 0.000000e+00 : f32
      %12 = vector.broadcast %cst_10 : f32 to vector<256x128xf32>
      %c0_11 = arith.constant 0 : index
      %c0_12 = arith.constant 0 : index
      %13 = vector.load %arg7[%c0_11, %c0_12] : memref<256x128xf32, #tpu.memory_space<vmem>>, vector<256x128xf32>
      tpu.vector_store %arg7[%c0_11, %c0_12], %12 {strides = array<i32>} : memref<256x128xf32, #tpu.memory_space<vmem>>, vector<256x128xf32>,
    } else {
    }
    %c0 = arith.constant 0 : index
    %c0_1 = arith.constant 0 : index
    %3 = vector.load %arg7[%c0, %c0_1] : memref<256x128xf32, #tpu.memory_space<vmem>>, vector<256x128xf32>
    %c0_2 = arith.constant 0 : index
    %c0_3 = arith.constant 0 : index
    %4 = vector.load %arg3[%c0_2, %c0_3] : memref<256x36xbf16, #tpu.memory_space<vmem>>, vector<256x36xbf16>
    %c0_4 = arith.constant 0 : index
    %c0_5 = arith.constant 0 : index
    %5 = vector.load %arg4[%c0_4, %c0_5] : memref<36x128xbf16, #tpu.memory_space<vmem>>, vector<36x128xbf16>
    %cst = arith.constant dense<0.000000e+00> : vector<256x128xf32>
    %6 = tpu.matmul %4, %5, %cst {dimension_numbers = #tpu.dot_dimension_numbers<[1], [0], [0], [1], [0, 0, 1, 1], [], []>} : vector<256x36xbf16>, vector<36x128xbf16>, vector<256x128xf32> -> vector<256x128xf32>
    %7 = arith.addf %3, %6 : vector<256x128xf32>
    %c0_6 = arith.constant 0 : index
    %c0_7 = arith.constant 0 : index
    %8 = vector.load %arg7[%c0_6, %c0_7] : memref<256x128xf32, #tpu.memory_space<vmem>>, vector<256x128xf32>
    tpu.vector_store %arg7[%c0_6, %c0_7], %7 {strides = array<i32>} : memref<256x128xf32, #tpu.memory_space<vmem>>, vector<256x128xf32>,
    %c0_i32_8 = arith.constant 0 : i32
    %9 = arith.cmpi eq, %arg2, %c0_i32_8 : i32
    %10 = arith.extui %9 : i1 to i32
    %c0_i32_9 = arith.constant 0 : i32
    %11 = arith.cmpi ne, %10, %c0_i32_9 : i32
    scf.if %11 {
      %c0_10 = arith.constant 0 : index
      %c0_11 = arith.constant 0 : index
      %12 = vector.load %arg7[%c0_10, %c0_11] : memref<256x128xf32, #tpu.memory_space<vmem>>, vector<256x128xf32>
      %c0_12 = arith.constant 0 : index
      %c0_13 = arith.constant 0 : index
      %13 = vector.load %arg5[%c0_12, %c0_13] : memref<1x128xf32, #tpu.memory_space<vmem>>, vector<1x128xf32>
      %14 = vector.broadcast %13 : vector<1x128xf32> to vector<256x128xf32>
      %15 = arith.addf %12, %14 : vector<256x128xf32>
      %16 = arith.negf %15 : vector<256x128xf32>
      %17 = math.exp %16 : vector<256x128xf32>
      %cst_14 = arith.constant 1.000000e+00 : f32
      %18 = vector.broadcast %cst_14 : f32 to vector<256x128xf32>
      %19 = arith.addf %18, %17 : vector<256x128xf32>
      %20 = arith.divf %18, %19 : vector<256x128xf32>
      %21 = arith.mulf %15, %20 : vector<256x128xf32>
      %c0_15 = arith.constant 0 : index
      %c0_16 = arith.constant 0 : index
      %22 = vector.load %arg6[%c0_15, %c0_16] : memref<256x128xf32, #tpu.memory_space<vmem>>, vector<256x128xf32>
      tpu.vector_store %arg6[%c0_15, %c0_16], %21 {strides = array<i32>} : memref<256x128xf32, #tpu.memory_space<vmem>>, vector<256x128xf32>,
    } else {
    }
    return
  }
  func.func @transform_0(%arg0: i32, %arg1: i32, %arg2: i32) -> (i32, i32) {
    %c0_i32 = arith.constant 0 : i32
    return %arg0, %arg2 : i32, i32
  }
  func.func @transform_1(%arg0: i32, %arg1: i32, %arg2: i32) -> (i32, i32) {
    %c0_i32 = arith.constant 0 : i32
    return %arg2, %arg1 : i32, i32
  }
  func.func @transform_2(%arg0: i32, %arg1: i32, %arg2: i32) -> (i32, i32) {
    %c0_i32 = arith.constant 0 : i32
    %c0_i32_0 = arith.constant 0 : i32
    return %c0_i32, %arg1 : i32, i32
  }
  func.func @transform_3(%arg0: i32, %arg1: i32, %arg2: i32) -> (i32, i32) {
    %c0_i32 = arith.constant 0 : i32
    return %arg0, %arg1 : i32, i32
  }
}

</mosaic_0001>

<bundles_post_ra>
// kernel: conv_bn_silu_forward.1
= control target key start
LH: loop header
LB: loop body
LE: loop exit
PB: predicated region body
PF: predicated region fallthrough
CT: control target
= control target key end

     0   :  { %s1878_s12 = smov 0   ;;  %s1880_s13 = smov 0   ;;  %s2622_s0 = inlined_call_operand.vmem [shape: bf16[512,36], index: 0, kind: input, shape index: {}]   ;;  %s2623_s1 = inlined_call_operand.vmem [shape: bf16[36,128], index: 1, kind: input, shape index: {}]   ;;  %s2624_s2 = inlined_call_operand.vmem [shape: f32[1,128], index: 2, kind: input, shape index: {}]   ;;  %s2625_s3 = inlined_call_operand.vmem [shape: f32[512,128], index: 3, kind: output, shape index: {}]  }
   0x1   :  { %s1882_s14 = smov 0  }
   0x2 LB: > { %s32_s15 = sadd.s32 1, %s1852_s13  ;;  %p1526_p0 = scmp.ge.s32.totalorder %s1856_s14, 1  ;;  %s1856_s14 = sphi %s1882_s14, %s13_s14   ;;  %s1852_s13 = sphi %s1880_s13, %s2681_s13   ;;  %s1848_s12 = sphi %s1878_s12, %s2680_s12  }
   0x3   : > { %p34_p1 = scmp.ge.s32.totalorder %s32_s15, 2  ;;  %p188_p2 = scmp.lt.s32.totalorder %s1856_s14, 3 }
   0x5   : > { %s2683_s15 = smov (%p34_p1, %s32_s15), 0  ;;  %p189_p3 = pnand %p1526_p0, %p188_p2 }
   0x6   : > { %s1527_s18 = sshll.u32 (!%p189_p3), %s1848_s12, 5 }
   0x7   : > { %192 = sbr.rel (%p189_p3) target bundleno = 317 (0x13d), region = 32  ;;  %p230_p4 = scmp.lt.s32.totalorder (!%p189_p3), %s1527_s18, 63 }
   0xc   : > { %v364_v0 = vld [vmem:[%s2623_s1 + $0x10] sm:$0x3]  ;;  %vm509_vm0 = vcmask 1041408   ;;  %s2685_s18 = smov (!%p230_p4, %s1527_s18), 63  ;;  %v1670_v4 = vld [vmem:[%s2623_s1 + $0x8] sm:$0xff]  ;;  %v1669_v5 = vld [vmem:[%s2623_s1] sm:$0xff] }
   0xd   : > { %v454_v1 = vunpack.c.l.b16 %v364_v0  ;;  %s1528_s21 = sshll.u32 %s2685_s18, 2  ;;  %vm460_vm1 = vcmask 293888   ;;  %v1948_v22 = vld [vmem:[%s2624_s2] ss:$0 sm:$0xff]  ;;  %s1530_s29 = sshll.u32 %s2685_s18, 3 }
   0xe   : > { %s1911_s26 = scalar_lea.vmem %s2622_s0, %s1528_s21  ;;  %s2047_s5 = scalar_lea.vmem %s2625_s3, %s1530_s29 }
   0xf   : > { %v457_v2 = vpack.c.b16 %v454_v1, %v454_v1  ;;  %v1653_v6 = vld [vmem:[%s1911_s26] sm:$0xff]  ;;  %v1654_v10 = vld [vmem:[%s1911_s26 + $0x8] sm:$0xff]  ;;  %v1655_v14 = vld [vmem:[%s1911_s26 + $0x10] sm:$0xff] }
  0x10   : > { %v1657_v7 = vld [vmem:[%s1911_s26 + $0x20] sm:$0xff]  ;;  %v1658_v11 = vld [vmem:[%s1911_s26 + $0x28] sm:$0xff]  ;;  %v1659_v15 = vld [vmem:[%s1911_s26 + $0x30] sm:$0xff] }
  0x11   : > { %v511_v3 = vsel %vm509_vm0, %v457_v2, 0  ;;  %v1661_v8 = vld [vmem:[%s1911_s26 + $0x40] sm:$0xff]  ;;  %v1662_v12 = vld [vmem:[%s1911_s26 + $0x48] sm:$0xff]  ;;  %v1663_v16 = vld [vmem:[%s1911_s26 + $0x50] sm:$0xff] }
  0x12   : > { %518 = vmatpush.bf16.msra.mxu0 %v511_v3  ;;  %1671 = vmatpush.bf16.msra.mxu1 %v511_v3  ;;  %v1665_v9 = vld [vmem:[%s1911_s26 + $0x60] sm:$0xff]  ;;  %v1666_v13 = vld [vmem:[%s1911_s26 + $0x68] sm:$0xff]  ;;  %v1667_v17 = vld [vmem:[%s1911_s26 + $0x70] sm:$0xff] }
  0x13   : > { %1672 = vmatpush.bf16.msra.mxu2 %v511_v3  ;;  %1673 = vmatpush.bf16.msra.mxu3 %v511_v3  ;;  %v1656_v18 = vld [vmem:[%s1911_s26 + $0x18] sm:$0xff] }
  0x14   : > { %v1660_v19 = vld [vmem:[%s1911_s26 + $0x38] sm:$0xff] }
  0x15   : > { %v1664_v20 = vld [vmem:[%s1911_s26 + $0x58] sm:$0xff] }
  0x16   : > { %519 = vmatpush.bf16.msra.mxu0 %v1670_v4  ;;  %1674 = vmatpush.bf16.msra.mxu1 %v1670_v4  ;;  %v1668_v21 = vld [vmem:[%s1911_s26 + $0x78] sm:$0xff] }
  0x17   : > { %1675 = vmatpush.bf16.msra.mxu2 %v1670_v4  ;;  %1676 = vmatpush.bf16.msra.mxu3 %v1670_v4 }
  0x1a   : > { %520 = vmatpush.bf16.msra.mxu0 %v1669_v5  ;;  %1677 = vmatpush.bf16.msra.mxu1 %v1669_v5 }
  0x1b   : > { %1678 = vmatpush.bf16.msra.mxu2 %v1669_v5  ;;  %1679 = vmatpush.bf16.msra.mxu3 %v1669_v5 }
  0x1d   : > { %1603 = vmatmul.msk.bf16.vlgmr.msra.gmra.mxu0 %vm460_vm1, %v1653_v6  ;;  %1607 = vmatmul.msk.bf16.vlgmr.msra.gmra.mxu1 %vm460_vm1, %v1657_v7 }
  0x1e   : > { %1611 = vmatmul.msk.bf16.vlgmr.msra.gmra.mxu2 %vm460_vm1, %v1661_v8  ;;  %1615 = vmatmul.msk.bf16.vlgmr.msra.gmra.mxu3 %vm460_vm1, %v1665_v9 }
  0x2d   : > { %1604 = vmatmul.msk.bf16.gmra.mxu0 %vm460_vm1, %v1654_v10  ;;  %1608 = vmatmul.msk.bf16.gmra.mxu1 %vm460_vm1, %v1658_v11 }
  0x2e   : > { %1612 = vmatmul.msk.bf16.gmra.mxu2 %vm460_vm1, %v1662_v12  ;;  %1616 = vmatmul.msk.bf16.gmra.mxu3 %vm460_vm1, %v1666_v13 }
  0x3d   : > { %1605 = vmatmul.msk.bf16.gmra.mxu0 %vm460_vm1, %v1655_v14  ;;  %1609 = vmatmul.msk.bf16.gmra.mxu1 %vm460_vm1, %v1659_v15 }
  0x3e   : > { %1613 = vmatmul.msk.bf16.gmra.mxu2 %vm460_vm1, %v1663_v16  ;;  %1617 = vmatmul.msk.bf16.gmra.mxu3 %vm460_vm1, %v1667_v17 }
  0x4d   : > { %1606 = vmatmul.msk.bf16.gmra.mxu0 %vm460_vm1, %v1656_v18  ;;  %1610 = vmatmul.msk.bf16.gmra.mxu1 %vm460_vm1, %v1660_v19 }
  0x4e   : > { %1614 = vmatmul.msk.bf16.gmra.mxu2 %vm460_vm1, %v1664_v20  ;;  %1618 = vmatmul.msk.bf16.gmra.mxu3 %vm460_vm1, %v1668_v21 }
  0x9a   : > { %v522_v23 = vpop.f32.mrf.mxu0  ;;  %v542_v24 = vpop.f32.mrf.mxu1 }
  0x9b   : > { %v1951_v25 = vadd.f32 %v1948_v22, %v522_v23  ;;  %v1954_v26 = vadd.f32 %v1948_v22, %v542_v24 }
  0x9d   : > { %v1619_v27 = vmul.f32 -1.442695, %v1951_v25  ;;  %v1627_v28 = vmul.f32 -1.442695, %v1954_v26 }
  0x9f   : > { %1705 = vpow2.f32 %v1619_v27 }
  0xa0   : > { %1707 = vpow2.f32 %v1627_v28 }
  0xa1   : > { %v562_v29 = vpop.f32.mrf.mxu2  ;;  %v582_v30 = vpop.f32.mrf.mxu3 }
  0xa2   : > { %v1959_v31 = vadd.f32 %v1948_v22, %v562_v29  ;;  %v1962_v32 = vadd.f32 %v1948_v22, %v582_v30  ;;  %v524_v33 = vpop.f32.mrf.mxu0  ;;  %v544_v34 = vpop.f32.mrf.mxu1 }
  0xa3   : > { %v1965_v35 = vadd.f32 %v1948_v22, %v524_v33  ;;  %v1968_v36 = vadd.f32 %v1948_v22, %v544_v34 }
  0xa4   : > { %v1635_v37 = vmul.f32 -1.442695, %v1959_v31  ;;  %v1643_v38 = vmul.f32 -1.442695, %v1962_v32 }
  0xa5   : > { %v1706_v39 = vpop.eup %1705  ;;  %v1620_v42 = vmul.f32 -1.442695, %v1965_v35  ;;  %v1628_v44 = vmul.f32 -1.442695, %v1968_v36 }
  0xa6   : > { %v1708_v40 = vpop.eup %1707  ;;  %v1972_v41 = vadd.f32 1.0, %v1706_v39  ;;  %1709 = vpow2.f32 %v1635_v37 }
  0xa7   : > { %v1975_v43 = vadd.f32 1.0, %v1708_v40  ;;  %1711 = vpow2.f32 %v1643_v38 }
  0xa8   : > { %1713 = vrcp.f32 %v1972_v41  ;;  %v874_v49 = vand.u32 2147483647, %v1972_v41  ;;  %v876_v50 = vand.u32 2147483648, %v1972_v41  ;;  %vm870_vm2 = vweird.f32 %v1972_v41 }
  0xa9   : > { %1715 = vrcp.f32 %v1975_v43  ;;  %v564_v45 = vpop.f32.mrf.mxu2  ;;  %v584_v46 = vpop.f32.mrf.mxu3  ;;  %v994_v52 = vand.u32 2147483647, %v1975_v43  ;;  %v996_v53 = vand.u32 2147483648, %v1975_v43  ;;  %vm990_vm3 = vweird.f32 %v1975_v43 }
  0xaa   : > { %1717 = vpow2.f32 %v1620_v42  ;;  %v1981_v47 = vadd.f32 %v1948_v22, %v564_v45  ;;  %v527_v48 = vpop.f32.mrf.mxu0  ;;  %v1989_v55 = vadd.f32 %v1948_v22, %v584_v46  ;;  %v547_v61 = vpop.f32.mrf.mxu1  ;;  %vm2001_vm4 = vcmp.eq.f32.partialorder %v874_v49, 8.507059e+37 }
  0xab   : > { %1719 = vpow2.f32 %v1628_v44  ;;  %v1994_v58 = vadd.f32 %v1948_v22, %v527_v48  ;;  %v877_v1 = vor.u32 1.1754944e-38, %v876_v50  ;;  %vm2007_vm5 = vcmp.eq.f32.partialorder %v994_v52, 8.507059e+37 }
  0xac   : > { %v1710_v51 = vpop.eup %1709  ;;  %v1636_v54 = vmul.f32 -1.442695, %v1981_v47  ;;  %v997_v5 = vor.u32 1.1754944e-38, %v996_v53  ;;  %v1644_v6 = vmul.f32 -1.442695, %v1989_v55  ;;  %v2015_v10 = vadd.f32 %v1948_v22, %v547_v61 }
  0xad   : > { %v1712_v56 = vpop.eup %1711  ;;  %v1991_v57 = vadd.f32 1.0, %v1710_v51  ;;  %v1621_v9 = vmul.f32 -1.442695, %v1994_v58 }
  0xae   : > { %v1714_v59 = vpop.eup %1713  ;;  %v1998_v60 = vadd.f32 1.0, %v1712_v56  ;;  %v2029_v23 = vmul.f32 -1.442695, %v2015_v10 }
  0xaf   : > { %v1716_v62 = vpop.eup %1715  ;;  %v866_v63 = vmul.f32 %v1714_v59, %v1972_v41  ;;  %1721 = vrcp.f32 %v1991_v57  ;;  %vm871_vm6 = vweird.f32 %v1714_v59  ;;  %v1114_v12 = vand.u32 2147483647, %v1991_v57 }
  0xb0   : > { %v1718_v2 = vpop.eup %1717  ;;  %v986_v3 = vmul.f32 %v1716_v62, %v1975_v43  ;;  %1723 = vpow2.f32 %v1636_v54  ;;  %v1116_v13 = vand.u32 2147483648, %v1991_v57  ;;  %v1236_v15 = vand.u32 2147483648, %v1998_v60  ;;  %vm872_vm9 = vmor %vm870_vm2, %vm871_vm6 }
  0xb1   : > { %v1720_v7 = vpop.eup %1719  ;;  %v867_v8 = vsub.f32 1.0, %v866_v63  ;;  %1725 = vrcp.f32 %v1998_v60  ;;  %v2020_v16 = vadd.f32 1.0, %v1718_v2  ;;  %vm991_vm7 = vweird.f32 %v1716_v62  ;;  %v567_v30 = vpop.f32.mrf.mxu2 }
  0xb2   : > { %v987_v11 = vsub.f32 1.0, %v986_v3  ;;  %v2022_v17 = vadd.f32 1.0, %v1720_v7  ;;  %v1234_v19 = vand.u32 2147483647, %v1998_v60  ;;  %1727 = vpow2.f32 %v1644_v6  ;;  %vm992_vm12 = vmor %vm990_vm3, %vm991_vm7 }
  0xb3   : > { %v868_v14 = vmul.f32 %v1714_v59, %v867_v8  ;;  %vm1110_vm8 = vweird.f32 %v1991_v57  ;;  %1729 = vrcp.f32 %v2020_v16  ;;  %vm2035_vm10 = vcmp.eq.f32.partialorder %v1114_v12, 8.507059e+37 }
  0xb4   : > { %v988_v18 = vmul.f32 %v1716_v62, %v987_v11  ;;  %vm1230_vm11 = vweird.f32 %v1998_v60  ;;  %v1117_v37 = vor.u32 1.1754944e-38, %v1116_v13  ;;  %v1237_v38 = vor.u32 1.1754944e-38, %v1236_v15 }
  0xb5   : > { %v1722_v20 = vpop.eup %1721  ;;  %v869_v21 = vadd.f32 %v1714_v59, %v868_v14  ;;  %1731 = vrcp.f32 %v2022_v17  ;;  %vm2052_vm13 = vcmp.eq.f32.partialorder %v1234_v19, 8.507059e+37  ;;  %v889_v46 = vand.u32 2147483647, %v2020_v16 }
  0xb6   : > { %v1724_v24 = vpop.eup %1723  ;;  %v989_v27 = vadd.f32 %v1716_v62, %v988_v18  ;;  %v1106_v28 = vmul.f32 %v1722_v20, %v1991_v57  ;;  %v2061_v48 = vadd.f32 %v1948_v22, %v567_v30  ;;  %vm1111_vm14 = vweird.f32 %v1722_v20  ;;  %v587_v18 = vpop.f32.mrf.mxu3 }
  0xb7   : > { %v1726_v33 = vpop.eup %1725  ;;  %v873_v34 = vsel %vm872_vm9, %v1714_v59, %v869_v21  ;;  %vm885_vm15 = vweird.f32 %v2020_v16  ;;  %v2067_v54 = vadd.f32 1.0, %v1724_v24  ;;  %1733 = vpow2.f32 %v1621_v9  ;;  %vm1112_vm1 = vmor %vm1110_vm8, %vm1111_vm14 }
  0xb8   : > { %v878_v39 = vsel %vm2001_vm4, %v877_v1, %v873_v34  ;;  %v993_v40 = vsel %vm992_vm12, %v1716_v62, %v989_v27  ;;  %v1107_v41 = vsub.f32 1.0, %v1106_v28  ;;  %v1226_v42 = vmul.f32 %v1726_v33, %v1998_v60  ;;  %v1728_v49 = vpop.eup %1727 }
  0xb9   : > { %v1345_v44 = vmul.f32 %v878_v39, %v1951_v25  ;;  %v998_v45 = vsel %vm2007_vm5, %v997_v5, %v993_v40  ;;  %v1730_v53 = vpop.eup %1729  ;;  %v891_v25 = vand.u32 2147483648, %v2020_v16  ;;  %vm1231_vm0 = vweird.f32 %v1726_v33 }
  0xba   : > { %v1353_v50 = vmul.f32 %v998_v45, %v1954_v26  ;;  %v1108_v51 = vmul.f32 %v1722_v20, %v1107_v41  ;;  %v1227_v52 = vsub.f32 1.0, %v1226_v42  ;;  %v881_v61 = vmul.f32 %v1730_v53, %v2020_v16  ;;  %vm1232_vm3 = vmor %vm1230_vm11, %vm1231_vm0  ;;  %v549_v45 = vpop.f32.mrf.mxu1 }
  0xbb   : > { %1377 = vst [vmem:[%s2047_s5] sm:$0xff] %v1345_v44  ;;  %v1732_v62 = vpop.eup %1731  ;;  %vm2073_vm2 = vcmp.eq.f32.partialorder %v889_v46, 8.507059e+37  ;;  %v1009_v63 = vand.u32 2147483647, %v2022_v17  ;;  %1735 = vrcp.f32 %v2067_v54  ;;  %v2079_v0 = vadd.f32 1.0, %v1728_v49 }
  0xbc   : > { %1385 = vst [vmem:[%s2047_s5 + $0x40] sm:$0xff] %v1353_v50  ;;  %v1109_v56 = vadd.f32 %v1722_v20, %v1108_v51  ;;  %v1228_v59 = vmul.f32 %v1726_v33, %v1227_v52  ;;  %v882_v3 = vsub.f32 1.0, %v881_v61  ;;  %v1001_v4 = vmul.f32 %v1732_v62, %v2022_v17 }
  0xbd   : > { %vm886_vm4 = vweird.f32 %v1730_v53  ;;  %vm1005_vm5 = vweird.f32 %v2022_v17  ;;  %v1011_v5 = vand.u32 2147483648, %v2022_v17  ;;  %v1734_v11 = vpop.eup %1733  ;;  %v892_v13 = vor.u32 1.1754944e-38, %v891_v25  ;;  %v569_v25 = vpop.f32.mrf.mxu2 }
  0xbe   : > { %v1113_v1 = vsel %vm1112_vm1, %v1722_v20, %v1109_v56  ;;  %v1229_v2 = vadd.f32 %v1726_v33, %v1228_v59  ;;  %v883_v8 = vmul.f32 %v1730_v53, %v882_v3  ;;  %v1002_v9 = vsub.f32 1.0, %v1001_v4  ;;  %vm887_vm8 = vmor %vm885_vm15, %vm886_vm4 }
  0xbf   : > { %v1118_v57 = vsel %vm2035_vm10, %v1117_v37, %v1113_v1  ;;  %vm2091_vm6 = vcmp.eq.f32.partialorder %v1009_v63, 8.507059e+37  ;;  %1737 = vrcp.f32 %v2079_v0  ;;  %vm1006_vm7 = vweird.f32 %v1732_v62 }
  0xc0   : > { %v1361_v6 = vmul.f32 %v1118_v57, %v1959_v31  ;;  %v1233_v7 = vsel %vm1232_vm3, %v1726_v33, %v1229_v2  ;;  %v884_v15 = vadd.f32 %v1730_v53, %v883_v8  ;;  %v1003_v31 = vmul.f32 %v1732_v62, %v1002_v9  ;;  %vm1007_vm9 = vmor %vm1005_vm5, %vm1006_vm7  ;;  %v589_v2 = vpop.f32.mrf.mxu3 }
  0xc1   : > { %v1238_v12 = vsel %vm2052_vm13, %v1237_v38, %v1233_v7  ;;  %v1736_v19 = vpop.eup %1735  ;;  %v1129_v20 = vand.u32 2147483647, %v2067_v54  ;;  %v1131_v21 = vand.u32 2147483648, %v2067_v54  ;;  %v2103_v24 = vadd.f32 1.0, %v1734_v11  ;;  %v529_v38 = vpop.f32.mrf.mxu0 }
  0xc2   : > { %1393 = vst [vmem:[%s2047_s5 + $0x80] sm:$0xff] %v1361_v6  ;;  %v1369_v60 = vmul.f32 %v1238_v12, %v1962_v32  ;;  %1739 = vpow2.f32 %v2029_v23  ;;  %v888_v27 = vsel %vm887_vm8, %v1730_v53, %v884_v15  ;;  %v1004_v32 = vadd.f32 %v1732_v62, %v1003_v31 }
  0xc3   : > { %v1012_v28 = vor.u32 1.1754944e-38, %v1011_v5  ;;  %v1121_v29 = vmul.f32 %v1736_v19, %v2067_v54  ;;  %v893_v30 = vsel %vm2073_vm2, %v892_v13, %v888_v27  ;;  %vm1125_vm10 = vweird.f32 %v2067_v54 }
  0xc4   : > { %1401 = vst [vmem:[%s2047_s5 + $0xc0] sm:$0xff] %v1369_v60  ;;  %v1249_v16 = vand.u32 2147483647, %v2079_v0  ;;  %1741 = vrcp.f32 %v2103_v24  ;;  %v1346_v23 = vmul.f32 %v893_v30, %v1965_v35  ;;  %v1008_v33 = vsel %vm1007_vm9, %v1732_v62, %v1004_v32 }
  0xc5   : > { %v1122_v34 = vsub.f32 1.0, %v1121_v29  ;;  %v1251_v37 = vand.u32 2147483648, %v2079_v0  ;;  %v1738_v39 = vpop.eup %1737  ;;  %v1013_v40 = vsel %vm2091_vm6, %v1012_v28, %v1008_v33  ;;  %vm2119_vm11 = vcmp.eq.f32.partialorder %v1129_v20, 8.507059e+37  ;;  %v572_v49 = vpop.f32.mrf.mxu2 }
  0xc6   : > { %v1132_v41 = vor.u32 1.1754944e-38, %v1131_v21  ;;  %v1637_v42 = vmul.f32 -1.442695, %v2061_v48  ;;  %1378 = vst [vmem:[%s2047_s5 + $0x8] sm:$0xff] %v1346_v23  ;;  %v1354_v35 = vmul.f32 %v1013_v40, %v1968_v36  ;;  %vm1126_vm12 = vweird.f32 %v1736_v19 }
  0xc7   : > { %v1123_v43 = vmul.f32 %v1736_v19, %v1122_v34  ;;  %v1241_v44 = vmul.f32 %v1738_v39, %v2079_v0  ;;  %vm1245_vm13 = vweird.f32 %v2079_v0  ;;  %vm2128_vm14 = vcmp.eq.f32.partialorder %v1249_v16, 8.507059e+37  ;;  %vm1127_vm15 = vmor %vm1125_vm10, %vm1126_vm12 }
  0xc8   : > { %v1740_v46 = vpop.eup %1739  ;;  %1743 = vpow2.f32 %v1637_v42  ;;  %v2133_v50 = vadd.f32 %v1948_v22, %v587_v18  ;;  %1386 = vst [vmem:[%s2047_s5 + $0x48] sm:$0xff] %v1354_v35  ;;  %v1252_v36 = vor.u32 1.1754944e-38, %v1251_v37  ;;  %vm900_vm0 = vweird.f32 %v2103_v24 }
  0xc9   : > { %v1124_v51 = vadd.f32 %v1736_v19, %v1123_v43  ;;  %v1242_v52 = vsub.f32 1.0, %v1241_v44  ;;  %v2136_v53 = vadd.f32 1.0, %v1740_v46  ;;  %v2144_v61 = vadd.f32 %v1948_v22, %v529_v38  ;;  %v532_v60 = vpop.f32.mrf.mxu0 }
  0xca   : > { %v1742_v56 = vpop.eup %1741  ;;  %v1645_v59 = vmul.f32 -1.442695, %v2133_v50  ;;  %v2147_v62 = vadd.f32 %v1948_v22, %v549_v45  ;;  %vm1246_vm1 = vweird.f32 %v1738_v39  ;;  %v906_v3 = vand.u32 2147483648, %v2103_v24 }
  0xcb   : > { %v1128_v26 = vsel %vm1127_vm15, %v1736_v19, %v1124_v51  ;;  %v1243_v63 = vmul.f32 %v1738_v39, %v1242_v52  ;;  %v896_v1 = vmul.f32 %v1742_v56, %v2103_v24  ;;  %1745 = vrcp.f32 %v2136_v53  ;;  %vm1247_vm2 = vmor %vm1245_vm13, %vm1246_vm1  ;;  %v592_v51 = vpop.f32.mrf.mxu3 }
  0xcc   : > { %v1133_v54 = vsel %vm2119_vm11, %v1132_v41, %v1128_v26  ;;  %v2155_v4 = vadd.f32 %v1948_v22, %v569_v25  ;;  %v904_v7 = vand.u32 2147483647, %v2103_v24  ;;  %1747 = vpow2.f32 %v1645_v59  ;;  %v552_v41 = vpop.f32.mrf.mxu1 }
  0xcd   : > { %v1362_v57 = vmul.f32 %v1133_v54, %v1981_v47  ;;  %v1244_v5 = vadd.f32 %v1738_v39, %v1243_v63  ;;  %v897_v6 = vsub.f32 1.0, %v896_v1  ;;  %v1622_v9 = vmul.f32 -1.442695, %v2144_v61 }
  0xce   : > { %v1744_v8 = vpop.eup %1743  ;;  %v1630_v11 = vmul.f32 -1.442695, %v2147_v62  ;;  %v2164_v12 = vadd.f32 %v1948_v22, %v589_v2  ;;  %vm901_vm3 = vweird.f32 %v1742_v56  ;;  %v907_v15 = vor.u32 1.1754944e-38, %v906_v3 }
  0xcf   : > { %1394 = vst [vmem:[%s2047_s5 + $0x88] sm:$0xff] %v1362_v57  ;;  %v1248_v13 = vsel %vm1247_vm2, %v1738_v39, %v1244_v5  ;;  %v898_v14 = vmul.f32 %v1742_v56, %v897_v6  ;;  %v2167_v47 = vadd.f32 1.0, %v1744_v8  ;;  %1749 = vpow2.f32 %v1622_v9  ;;  %vm902_vm4 = vmor %vm900_vm0, %vm901_vm3 }
  0xd0   : > { %v1253_v0 = vsel %vm2128_vm14, %v1252_v36, %v1248_v13  ;;  %v1638_v31 = vmul.f32 -1.442695, %v2155_v4  ;;  %v1024_v20 = vand.u32 2147483647, %v2136_v53  ;;  %v1026_v27 = vand.u32 2147483648, %v2136_v53 }
  0xd1   : > { %v1370_v18 = vmul.f32 %v1253_v0, %v1989_v55  ;;  %v899_v19 = vadd.f32 %v1742_v56, %v898_v14  ;;  %1751 = vrcp.f32 %v2167_v47  ;;  %v1746_v21 = vpop.eup %1745  ;;  %v1646_v32 = vmul.f32 -1.442695, %v2164_v12  ;;  %v534_v1 = vpop.f32.mrf.mxu0 }
  0xd2   : > { %1753 = vpow2.f32 %v1630_v11  ;;  %v2180_v28 = vadd.f32 %v1948_v22, %v532_v60  ;;  %vm905_vm5 = vcmp.eq.f32.partialorder %v904_v7, 8.507059e+37  ;;  %v1016_v55 = vmul.f32 %v1746_v21, %v2136_v53  ;;  %v1748_v30 = vpop.eup %1747 }
  0xd3   : > { %1402 = vst [vmem:[%s2047_s5 + $0xc8] sm:$0xff] %v1370_v18  ;;  %v903_v29 = vsel %vm902_vm4, %v1742_v56, %v899_v19  ;;  %v1144_v23 = vand.u32 2147483647, %v2167_v47  ;;  %v1146_v24 = vand.u32 2147483648, %v2167_v47  ;;  %1755 = vpow2.f32 %v1638_v31 }
  0xd4   : > { %v908_v16 = vsel %vm905_vm5, %v907_v15, %v903_v29  ;;  %v1017_v34 = vsub.f32 1.0, %v1016_v55  ;;  %v2187_v37 = vadd.f32 1.0, %v1748_v30  ;;  %v1623_v38 = vmul.f32 -1.442695, %v2180_v28 }
  0xd5   : > { %v1347_v33 = vmul.f32 %v908_v16, %v1994_v58  ;;  %v1750_v39 = vpop.eup %1749  ;;  %vm1020_vm6 = vweird.f32 %v2136_v53  ;;  %vm2191_vm7 = vcmp.eq.f32.partialorder %v1024_v20, 8.507059e+37  ;;  %v1027_v17 = vor.u32 1.1754944e-38, %v1026_v27 }
  0xd6   : > { %1757 = vpow2.f32 %v1646_v32  ;;  %v1018_v35 = vmul.f32 %v1746_v21, %v1017_v34  ;;  %vm1021_vm8 = vweird.f32 %v1746_v21  ;;  %vm1140_vm9 = vweird.f32 %v2167_v47 }
  0xd7   : > { %v1752_v42 = vpop.eup %1751  ;;  %1379 = vst [vmem:[%s2047_s5 + $0x10] sm:$0xff] %v1347_v33  ;;  %1759 = vrcp.f32 %v2187_v37  ;;  %vm2199_vm10 = vcmp.eq.f32.partialorder %v1144_v23, 8.507059e+37  ;;  %v1147_v45 = vor.u32 1.1754944e-38, %v1146_v24  ;;  %v2203_v46 = vadd.f32 1.0, %v1750_v39  ;;  %vm1022_vm11 = vmor %vm1020_vm6, %vm1021_vm8 }
  0xd8   : > { %v1754_v58 = vpop.eup %1753  ;;  %v1136_v43 = vmul.f32 %v1752_v42, %v2167_v47  ;;  %v1019_v52 = vadd.f32 %v1746_v21, %v1018_v35  ;;  %1761 = vpow2.f32 %v1623_v38  ;;  %v2208_v25 = vadd.f32 %v1948_v22, %v552_v41 }
  0xd9   : > { %v2205_v36 = vadd.f32 1.0, %v1754_v58  ;;  %v1756_v56 = vpop.eup %1755  ;;  %v1264_v26 = vand.u32 2147483647, %v2187_v37  ;;  %v1266_v63 = vand.u32 2147483648, %v2187_v37  ;;  %1763 = vrcp.f32 %v2203_v46 }
  0xda   : > { %v1137_v59 = vsub.f32 1.0, %v1136_v43  ;;  %v1023_v2 = vsel %vm1022_vm11, %v1746_v21, %v1019_v52  ;;  %v2218_v54 = vadd.f32 %v1948_v22, %v572_v49  ;;  %v2221_v3 = vadd.f32 %v1948_v22, %v592_v51 }
  0xdb   : > { %1765 = vrcp.f32 %v2205_v36  ;;  %v1028_v57 = vsel %vm2191_vm7, %v1027_v17, %v1023_v2  ;;  %vm1141_vm12 = vweird.f32 %v1752_v42  ;;  %v921_v6 = vand.u32 2147483648, %v2203_v46 }
  0xdc   : > { %v1758_v53 = vpop.eup %1757  ;;  %v1138_v5 = vmul.f32 %v1752_v42, %v1137_v59  ;;  %v1355_v8 = vmul.f32 %v1028_v57, %v2015_v10  ;;  %vm1260_vm13 = vweird.f32 %v2187_v37  ;;  %v919_v9 = vand.u32 2147483647, %v2203_v46  ;;  %vm1142_vm15 = vmor %vm1140_vm9, %vm1141_vm12 }
  0xdd   : > { %v1760_v7 = vpop.eup %1759  ;;  %v2230_v11 = vadd.f32 %v1948_v22, %v534_v1  ;;  %vm2233_vm14 = vcmp.eq.f32.partialorder %v1264_v26, 8.507059e+37  ;;  %v1267_v0 = vor.u32 1.1754944e-38, %v1266_v63  ;;  %vm915_vm0 = vweird.f32 %v2203_v46 }
  0xde   : > { %v1139_v13 = vadd.f32 %v1752_v42, %v1138_v5  ;;  %v1256_v14 = vmul.f32 %v1760_v7, %v2187_v37  ;;  %v1762_v15 = vpop.eup %1761  ;;  %1387 = vst [vmem:[%s2047_s5 + $0x50] sm:$0xff] %v1355_v8  ;;  %v1039_v10 = vand.u32 2147483647, %v2205_v36  ;;  %v1041_v31 = vand.u32 2147483648, %v2205_v36  ;;  %v554_v8 = vpop.f32.mrf.mxu1 }
  0xdf   : > { %v2243_v18 = vadd.f32 1.0, %v1756_v56  ;;  %v1764_v19 = vpop.eup %1763  ;;  %v922_v27 = vor.u32 1.1754944e-38, %v921_v6  ;;  %vm1035_vm1 = vweird.f32 %v2205_v36  ;;  %v2246_v32 = vadd.f32 1.0, %v1758_v53 }
  0xe0   : > { %v1143_v20 = vsel %vm1142_vm15, %v1752_v42, %v1139_v13  ;;  %v1257_v21 = vsub.f32 1.0, %v1256_v14  ;;  %vm1261_vm2 = vweird.f32 %v1760_v7  ;;  %v911_v55 = vmul.f32 %v1764_v19, %v2203_v46 }
  0xe1   : > { %v1766_v29 = vpop.eup %1765  ;;  %v1148_v47 = vsel %vm2199_vm10, %v1147_v45, %v1143_v20  ;;  %vm2251_vm3 = vcmp.eq.f32.partialorder %v919_v9, 8.507059e+37  ;;  %1767 = vrcp.f32 %v2243_v18  ;;  %v2258_v33 = vadd.f32 1.0, %v1762_v15  ;;  %vm1262_vm5 = vmor %vm1260_vm13, %vm1261_vm2 }
  0xe2   : > { %v1363_v16 = vmul.f32 %v1148_v47, %v2061_v48  ;;  %v1258_v23 = vmul.f32 %v1760_v7, %v1257_v21  ;;  %v1031_v24 = vmul.f32 %v1766_v29, %v2205_v36  ;;  %v912_v34 = vsub.f32 1.0, %v911_v55 }
  0xe3   : > { %vm2260_vm4 = vcmp.eq.f32.partialorder %v1039_v10, 8.507059e+37  ;;  %v1042_v39 = vor.u32 1.1754944e-38, %v1041_v31  ;;  %v1631_v40 = vmul.f32 -1.442695, %v2208_v25  ;;  %v1159_v42 = vand.u32 2147483647, %v2243_v18  ;;  %v594_v31 = vpop.f32.mrf.mxu3 }
  0xe4   : > { %1395 = vst [vmem:[%s2047_s5 + $0x90] sm:$0xff] %v1363_v16  ;;  %v1259_v17 = vadd.f32 %v1760_v7, %v1258_v23  ;;  %v1032_v41 = vsub.f32 1.0, %v1031_v24  ;;  %1769 = vrcp.f32 %v2246_v32  ;;  %v913_v48 = vmul.f32 %v1764_v19, %v912_v34 }
  0xe5   : > { %vm916_vm6 = vweird.f32 %v1764_v19  ;;  %v1161_v35 = vand.u32 2147483648, %v2243_v18  ;;  %v1639_v58 = vmul.f32 -1.442695, %v2218_v54  ;;  %vm1036_vm7 = vweird.f32 %v1766_v29 }
  0xe6   : > { %v1263_v43 = vsel %vm1262_vm5, %v1760_v7, %v1259_v17  ;;  %v1033_v44 = vmul.f32 %v1766_v29, %v1032_v41  ;;  %1771 = vrcp.f32 %v2258_v33  ;;  %v914_v51 = vadd.f32 %v1764_v19, %v913_v48  ;;  %vm917_vm9 = vmor %vm915_vm0, %vm916_vm6 }
  0xe7   : > { %v1768_v45 = vpop.eup %1767  ;;  %v1268_v49 = vsel %vm2233_vm14, %v1267_v0, %v1263_v43  ;;  %vm1155_vm8 = vweird.f32 %v2243_v18  ;;  %v1279_v37 = vand.u32 2147483647, %v2246_v32  ;;  %vm2282_vm10 = vcmp.eq.f32.partialorder %v1159_v42, 8.507059e+37  ;;  %vm1037_vm11 = vmor %vm1035_vm1, %vm1036_vm7  ;;  %v574_v0 = vpop.f32.mrf.mxu2 }
  0xe8   : > { %v1371_v52 = vmul.f32 %v1268_v49, %v2133_v50  ;;  %v1034_v56 = vadd.f32 %v1766_v29, %v1033_v44  ;;  %v1151_v59 = vmul.f32 %v1768_v45, %v2243_v18  ;;  %v918_v63 = vsel %vm917_vm9, %v1764_v19, %v914_v51 }
  0xe9   : > { %v1162_v1 = vor.u32 1.1754944e-38, %v1161_v35  ;;  %vm1275_vm12 = vweird.f32 %v2246_v32  ;;  %v1281_v2 = vand.u32 2147483648, %v2246_v32  ;;  %vm930_vm13 = vweird.f32 %v2258_v33 }
  0xea   : > { %v1770_v50 = vpop.eup %1769  ;;  %1403 = vst [vmem:[%s2047_s5 + $0xd0] sm:$0xff] %v1371_v52  ;;  %v923_v46 = vsel %vm2251_vm3, %v922_v27, %v918_v63  ;;  %v1038_v53 = vsel %vm1037_vm11, %v1766_v29, %v1034_v56  ;;  %v1152_v57 = vsub.f32 1.0, %v1151_v59  ;;  %1773 = vpow2.f32 %v1631_v40  ;;  %v557_v63 = vpop.f32.mrf.mxu1 }
  0xeb   : > { %v1348_v5 = vmul.f32 %v923_v46, %v2144_v61  ;;  %v1043_v36 = vsel %vm2260_vm4, %v1042_v39, %v1038_v53  ;;  %vm1156_vm14 = vweird.f32 %v1768_v45  ;;  %v1271_v6 = vmul.f32 %v1770_v50, %v2246_v32  ;;  %v537_v39 = vpop.f32.mrf.mxu0 }
  0xec   : > { %vm2298_vm15 = vcmp.eq.f32.partialorder %v1279_v37, 8.507059e+37  ;;  %v1772_v9 = vpop.eup %1771  ;;  %v1356_v13 = vmul.f32 %v1043_v36, %v2147_v62  ;;  %v1153_v14 = vmul.f32 %v1768_v45, %v1152_v57  ;;  %v934_v60 = vand.u32 2147483647, %v2258_v33  ;;  %vm1157_vm1 = vmor %vm1155_vm8, %vm1156_vm14 }
  0xed   : > { %v936_v61 = vand.u32 2147483648, %v2258_v33  ;;  %1380 = vst [vmem:[%s2047_s5 + $0x18] sm:$0xff] %v1348_v5  ;;  %v1272_v15 = vsub.f32 1.0, %v1271_v6  ;;  %vm1276_vm0 = vweird.f32 %v1770_v50  ;;  %v926_v10 = vmul.f32 %v1772_v9, %v2258_v33 }
  0xee   : > { %1775 = vpow2.f32 %v1639_v58  ;;  %1388 = vst [vmem:[%s2047_s5 + $0x58] sm:$0xff] %v1356_v13  ;;  %v1154_v19 = vadd.f32 %v1768_v45, %v1153_v14  ;;  %v1647_v20 = vmul.f32 -1.442695, %v2221_v3  ;;  %v1624_v21 = vmul.f32 -1.442695, %v2230_v11  ;;  %vm1277_vm3 = vmor %vm1275_vm12, %vm1276_vm0 }
  0xef   : > { %v2311_v62 = vadd.f32 %v1948_v22, %v554_v8  ;;  %v1273_v27 = vmul.f32 %v1770_v50, %v1272_v15  ;;  %v927_v29 = vsub.f32 1.0, %v926_v10  ;;  %vm931_vm2 = vweird.f32 %v1772_v9  ;;  %v577_v53 = vpop.f32.mrf.mxu2 }
  0xf0   : > { %v2317_v47 = vadd.f32 %v1948_v22, %v574_v0  ;;  %v1774_v55 = vpop.eup %1773  ;;  %v1158_v30 = vsel %vm1157_vm1, %v1768_v45, %v1154_v19  ;;  %1777 = vpow2.f32 %v1647_v20  ;;  %v2321_v23 = vadd.f32 %v1948_v22, %v594_v31  ;;  %vm932_vm5 = vmor %vm930_vm13, %vm931_vm2 }
  0xf1   : > { %v1632_v16 = vmul.f32 -1.442695, %v2311_v62  ;;  %v1163_v24 = vsel %vm2282_vm10, %v1162_v1, %v1158_v30  ;;  %v1274_v18 = vadd.f32 %v1770_v50, %v1273_v27  ;;  %v928_v34 = vmul.f32 %v1772_v9, %v927_v29 }
  0xf2   : > { %v2325_v38 = vadd.f32 1.0, %v1774_v55  ;;  %v1364_v40 = vmul.f32 %v1163_v24, %v2155_v4  ;;  %v1282_v17 = vor.u32 1.1754944e-38, %v1281_v2  ;;  %vm2331_vm4 = vcmp.eq.f32.partialorder %v934_v60, 8.507059e+37 }
  0xf3   : > { %1779 = vpow2.f32 %v1624_v21  ;;  %v1278_v48 = vsel %vm1277_vm3, %v1770_v50, %v1274_v18  ;;  %v929_v35 = vadd.f32 %v1772_v9, %v928_v34  ;;  %v937_v58 = vor.u32 1.1754944e-38, %v936_v61 }
  0xf4   : > { %v1776_v42 = vpop.eup %1775  ;;  %1781 = vrcp.f32 %v2325_v38  ;;  %1396 = vst [vmem:[%s2047_s5 + $0x98] sm:$0xff] %v1364_v40  ;;  %v1283_v4 = vsel %vm2298_vm15, %v1282_v17, %v1278_v48  ;;  %v1640_v43 = vmul.f32 -1.442695, %v2317_v47  ;;  %v2346_v44 = vadd.f32 %v1948_v22, %v537_v39 }
  0xf5   : > { %v2342_v32 = vadd.f32 1.0, %v1776_v42  ;;  %v1372_v45 = vmul.f32 %v1283_v4, %v2164_v12  ;;  %v933_v49 = vsel %vm932_vm5, %v1772_v9, %v929_v35  ;;  %1783 = vpow2.f32 %v1632_v16 }
  0xf6   : > { %v1648_v51 = vmul.f32 -1.442695, %v2321_v23  ;;  %v1778_v37 = vpop.eup %1777  ;;  %v938_v52 = vsel %vm2331_vm4, %v937_v58, %v933_v49  ;;  %v1054_v33 = vand.u32 2147483647, %v2325_v38  ;;  %v1056_v56 = vand.u32 2147483648, %v2325_v38 }
  0xf7   : > { %1785 = vrcp.f32 %v2342_v32  ;;  %1404 = vst [vmem:[%s2047_s5 + $0xd8] sm:$0xff] %v1372_v45  ;;  %v1349_v59 = vmul.f32 %v938_v52, %v2180_v28  ;;  %vm1050_vm6 = vweird.f32 %v2325_v38  ;;  %v2358_v12 = vadd.f32 1.0, %v1778_v37 }
  0xf8   : > { %1787 = vpow2.f32 %v1640_v43  ;;  %v1174_v2 = vand.u32 2147483647, %v2342_v32  ;;  %v1625_v46 = vmul.f32 -1.442695, %v2346_v44  ;;  %vm2366_vm7 = vcmp.eq.f32.partialorder %v1054_v33, 8.507059e+37 }
  0xf9   : > { %v1780_v26 = vpop.eup %1779  ;;  %1381 = vst [vmem:[%s2047_s5 + $0x20] sm:$0xff] %v1349_v59  ;;  %1789 = vpow2.f32 %v1648_v51  ;;  %v1057_v5 = vor.u32 1.1754944e-38, %v1056_v56  ;;  %vm1170_vm8 = vweird.f32 %v2342_v32  ;;  %v1176_v6 = vand.u32 2147483648, %v2342_v32 }
  0xfa   : > { %v1782_v1 = vpop.eup %1781  ;;  %v2362_v50 = vadd.f32 1.0, %v1780_v26  ;;  %1791 = vrcp.f32 %v2358_v12  ;;  %v2375_v7 = vadd.f32 %v1948_v22, %v557_v63  ;;  %v1296_v13 = vand.u32 2147483648, %v2358_v12 }
  0xfb   : > { %v1046_v57 = vmul.f32 %v1782_v1, %v2325_v38  ;;  %v1784_v36 = vpop.eup %1783  ;;  %v2381_v60 = vadd.f32 %v1948_v22, %v577_v53  ;;  %vm2384_vm9 = vcmp.eq.f32.partialorder %v1174_v2, 8.507059e+37  ;;  %v1294_v15 = vand.u32 2147483647, %v2358_v12 }
  0xfc   : > { %1793 = vrcp.f32 %v2362_v50  ;;  %v2378_v14 = vadd.f32 1.0, %v1784_v36  ;;  %v951_v10 = vand.u32 2147483648, %v2362_v50  ;;  %vm1051_vm10 = vweird.f32 %v1782_v1 }
  0xfd   : > { %v1786_v8 = vpop.eup %1785  ;;  %v1047_v9 = vsub.f32 1.0, %v1046_v57  ;;  %v949_v20 = vand.u32 2147483647, %v2362_v50  ;;  %v1177_v27 = vor.u32 1.1754944e-38, %v1176_v6  ;;  %vm1290_vm12 = vweird.f32 %v2358_v12  ;;  %vm1052_vm14 = vmor %vm1050_vm6, %vm1051_vm10 }
  0xfe   : > { %v1166_v61 = vmul.f32 %v1786_v8, %v2342_v32  ;;  %v1788_v31 = vpop.eup %1787  ;;  %1795 = vrcp.f32 %v2378_v14  ;;  %vm1171_vm11 = vweird.f32 %v1786_v8  ;;  %v1297_v30 = vor.u32 1.1754944e-38, %v1296_v13 }
  0xff   : > { %v1048_v19 = vmul.f32 %v1782_v1, %v1047_v9  ;;  %v1790_v21 = vpop.eup %1789  ;;  %vm945_vm13 = vweird.f32 %v2362_v50  ;;  %v2394_v16 = vadd.f32 1.0, %v1788_v31  ;;  %1797 = vpow2.f32 %v1625_v46  ;;  %vm1172_vm1 = vmor %vm1170_vm8, %vm1171_vm11 }
 0x100   : > { %v1167_v22 = vsub.f32 1.0, %v1166_v61  ;;  %v1792_v29 = vpop.eup %1791  ;;  %vm2400_vm15 = vcmp.eq.f32.partialorder %v1294_v15, 8.507059e+37  ;;  %v952_v40 = vor.u32 1.1754944e-38, %v951_v10  ;;  %v1069_v17 = vand.u32 2147483647, %v2378_v14 }
 0x101   : > { %v1049_v55 = vadd.f32 %v1782_v1, %v1048_v19  ;;  %v1286_v34 = vmul.f32 %v1792_v29, %v2358_v12  ;;  %vm2406_vm0 = vcmp.eq.f32.partialorder %v949_v20, 8.507059e+37  ;;  %v1071_v38 = vand.u32 2147483648, %v2378_v14  ;;  %v597_v12 = vpop.f32.mrf.mxu3 }
 0x102   : > { %v1794_v24 = vpop.eup %1793  ;;  %v1168_v18 = vmul.f32 %v1786_v8, %v1167_v22  ;;  %v2411_v35 = vadd.f32 1.0, %v1790_v21  ;;  %1799 = vrcp.f32 %v2394_v16  ;;  %vm1291_vm2 = vweird.f32 %v1792_v29  ;;  %v539_v22 = vpop.f32.mrf.mxu0 }
 0x103   : > { %v1053_v41 = vsel %vm1052_vm14, %v1782_v1, %v1049_v55  ;;  %v941_v42 = vmul.f32 %v1794_v24, %v2362_v50  ;;  %v1287_v43 = vsub.f32 1.0, %v1286_v34  ;;  %vm1065_vm3 = vweird.f32 %v2378_v14  ;;  %vm1292_vm6 = vmor %vm1290_vm12, %vm1291_vm2  ;;  %v559_v55 = vpop.f32.mrf.mxu1 }
 0x104   : > { %v1058_v58 = vsel %vm2366_vm7, %v1057_v5, %v1053_v41  ;;  %v1169_v4 = vadd.f32 %v1786_v8, %v1168_v18  ;;  %v1796_v45 = vpop.eup %1795  ;;  %vm2422_vm4 = vcmp.eq.f32.partialorder %v1069_v17, 8.507059e+37  ;;  %vm946_vm5 = vweird.f32 %v1794_v24  ;;  %v1833_v41 = vld [vmem:[%s2624_s2] ss:$0 sm:$0xff] }
 0x105   : > { %v1357_v49 = vmul.f32 %v1058_v58, %v2208_v25  ;;  %v942_v51 = vsub.f32 1.0, %v941_v42  ;;  %v1288_v52 = vmul.f32 %v1792_v29, %v1287_v43  ;;  %v1061_v33 = vmul.f32 %v1796_v45, %v2378_v14  ;;  %v1798_v59 = vpop.eup %1797 }
 0x106   : > { %v1173_v37 = vsel %vm1172_vm1, %v1786_v8, %v1169_v4  ;;  %v1072_v26 = vor.u32 1.1754944e-38, %v1071_v38  ;;  %1801 = vrcp.f32 %v2411_v35  ;;  %vm1066_vm7 = vweird.f32 %v1796_v45 }
 0x107   : > { %1389 = vst [vmem:[%s2047_s5 + $0x60] sm:$0xff] %v1357_v49  ;;  %v1178_v25 = vsel %vm2384_vm9, %v1177_v27, %v1173_v37  ;;  %v943_v32 = vmul.f32 %v1794_v24, %v942_v51  ;;  %v1289_v1 = vadd.f32 %v1792_v29, %v1288_v52  ;;  %v1062_v2 = vsub.f32 1.0, %v1061_v33  ;;  %vm947_vm9 = vmor %vm945_vm13, %vm946_vm5 }
 0x108   : > { %v1365_v63 = vmul.f32 %v1178_v25, %v2218_v54  ;;  %vm1185_vm8 = vweird.f32 %v2394_v16  ;;  %v1189_v53 = vand.u32 2147483647, %v2394_v16  ;;  %v1800_v57 = vpop.eup %1799  ;;  %v1191_v5 = vand.u32 2147483648, %v2394_v16  ;;  %vm1067_vm10 = vmor %vm1065_vm3, %vm1066_vm7 }
 0x109   : > { %v944_v46 = vadd.f32 %v1794_v24, %v943_v32  ;;  %v1293_v28 = vsel %vm1292_vm6, %v1792_v29, %v1289_v1  ;;  %v1063_v54 = vmul.f32 %v1796_v45, %v1062_v2  ;;  %v2440_v36 = vadd.f32 1.0, %v1798_v59  ;;  %v599_v37 = vpop.f32.mrf.mxu3 }
 0x10a   : > { %1397 = vst [vmem:[%s2047_s5 + $0xa0] sm:$0xff] %v1365_v63  ;;  %v1298_v6 = vsel %vm2400_vm15, %v1297_v30, %v1293_v28  ;;  %v1181_v9 = vmul.f32 %v1800_v57, %v2394_v16  ;;  %v1309_v13 = vand.u32 2147483647, %v2411_v35  ;;  %v1311_v15 = vand.u32 2147483648, %v2411_v35  ;;  %v579_v30 = vpop.f32.mrf.mxu2 }
 0x10b   : > { %v948_v8 = vsel %vm947_vm9, %v1794_v24, %v944_v46  ;;  %v1373_v61 = vmul.f32 %v1298_v6, %v2221_v3  ;;  %v1064_v0 = vadd.f32 %v1796_v45, %v1063_v54  ;;  %vm2454_vm11 = vcmp.eq.f32.partialorder %v1189_v53, 8.507059e+37 }
 0x10c   : > { %v953_v50 = vsel %vm2406_vm0, %v952_v40, %v948_v8  ;;  %v1182_v31 = vsub.f32 1.0, %v1181_v9  ;;  %1803 = vrcp.f32 %v2440_v36  ;;  %v1802_v3 = vpop.eup %1801  ;;  %vm1186_vm12 = vweird.f32 %v1800_v57 }
 0x10d   : > { %v1350_v10 = vmul.f32 %v953_v50, %v2230_v11  ;;  %1405 = vst [vmem:[%s2047_s5 + $0xe0] sm:$0xff] %v1373_v61  ;;  %v1068_v20 = vsel %vm1067_vm10, %v1796_v45, %v1064_v0  ;;  %v1192_v21 = vor.u32 1.1754944e-38, %v1191_v5  ;;  %vm1305_vm13 = vweird.f32 %v2411_v35  ;;  %vm1187_vm0 = vmor %vm1185_vm8, %vm1186_vm12 }
 0x10e   : > { %v1073_v11 = vsel %vm2422_vm4, %v1072_v26, %v1068_v20  ;;  %v1183_v14 = vmul.f32 %v1800_v57, %v1182_v31  ;;  %v1301_v27 = vmul.f32 %v1802_v3, %v2411_v35  ;;  %vm2465_vm14 = vcmp.eq.f32.partialorder %v1309_v13, 8.507059e+37 }
 0x10f   : > { %1382 = vst [vmem:[%s2047_s5 + $0x28] sm:$0xff] %v1350_v10  ;;  %v1358_v24 = vmul.f32 %v1073_v11, %v2311_v62  ;;  %vm1306_vm15 = vweird.f32 %v1802_v3  ;;  %v1312_v18 = vor.u32 1.1754944e-38, %v1311_v15  ;;  %v1633_v34 = vmul.f32 -1.442695, %v2375_v7 }
 0x110   : > { %v1184_v39 = vadd.f32 %v1800_v57, %v1183_v14  ;;  %v1302_v40 = vsub.f32 1.0, %v1301_v27  ;;  %v1641_v17 = vmul.f32 -1.442695, %v2381_v60  ;;  %v2475_v42 = vadd.f32 %v1833_v41, %v597_v12  ;;  %vm1307_vm2 = vmor %vm1305_vm13, %vm1306_vm15 }
 0x111   : > { %1390 = vst [vmem:[%s2047_s5 + $0x68] sm:$0xff] %v1358_v24  ;;  %1805 = vpow2.f32 %v1633_v34  ;;  %v2481_v62 = vadd.f32 %v1833_v41, %v539_v22  ;;  %v2483_v48 = vadd.f32 %v1833_v41, %v559_v55  ;;  %v2485_v38 = vadd.f32 %v1833_v41, %v579_v30 }
 0x112   : > { %v1804_v58 = vpop.eup %1803  ;;  %v1188_v4 = vsel %vm1187_vm0, %v1800_v57, %v1184_v39  ;;  %v1303_v43 = vmul.f32 %v1802_v3, %v1302_v40  ;;  %1807 = vpow2.f32 %v1641_v17  ;;  %v1649_v45 = vmul.f32 -1.442695, %v2475_v42 }
 0x113   : > { %v1193_v49 = vsel %vm2454_vm11, %v1192_v21, %v1188_v4  ;;  %v956_v16 = vmul.f32 %v1804_v58, %v2440_v36  ;;  %vm960_vm1 = vweird.f32 %v2440_v36  ;;  %v1626_v51 = vmul.f32 -1.442695, %v2481_v62 }
 0x114   : > { %v1366_v52 = vmul.f32 %v1193_v49, %v2317_v47  ;;  %v1304_v33 = vadd.f32 %v1802_v3, %v1303_v43  ;;  %1809 = vpow2.f32 %v1649_v45  ;;  %v1634_v56 = vmul.f32 -1.442695, %v2483_v48 }
 0x115   : > { %v957_v59 = vsub.f32 1.0, %v956_v16  ;;  %v964_v25 = vand.u32 2147483647, %v2440_v36  ;;  %1811 = vpow2.f32 %v1626_v51  ;;  %v1642_v32 = vmul.f32 -1.442695, %v2485_v38 }
 0x116   : > { %1398 = vst [vmem:[%s2047_s5 + $0xa8] sm:$0xff] %v1366_v52  ;;  %v1308_v26 = vsel %vm1307_vm2, %v1802_v3, %v1304_v33  ;;  %v966_v63 = vand.u32 2147483648, %v2440_v36  ;;  %1813 = vpow2.f32 %v1634_v56  ;;  %v2502_v47 = vadd.f32 %v1833_v41, %v599_v37 }
 0x117   : > { %v1806_v1 = vpop.eup %1805  ;;  %v1313_v2 = vsel %vm2465_vm14, %v1312_v18, %v1308_v26  ;;  %v958_v35 = vmul.f32 %v1804_v58, %v957_v59  ;;  %vm961_vm3 = vweird.f32 %v1804_v58  ;;  %1815 = vpow2.f32 %v1642_v32 }
 0x118   : > { %v1808_v46 = vpop.eup %1807  ;;  %v1374_v53 = vmul.f32 %v1313_v2, %v2321_v23  ;;  %v2507_v57 = vadd.f32 1.0, %v1806_v1  ;;  %vm962_vm4 = vmor %vm960_vm1, %vm961_vm3  ;;  %v967_v12 = vor.u32 1.1754944e-38, %v966_v63  ;;  %v1650_v6 = vmul.f32 -1.442695, %v2502_v47 }
 0x119   : > { %v959_v28 = vadd.f32 %v1804_v58, %v958_v35  ;;  %v2509_v54 = vadd.f32 1.0, %v1808_v46  ;;  %vm965_vm5 = vcmp.eq.f32.partialorder %v964_v25, 8.507059e+37 }
 0x11a   : > { %v1810_v5 = vpop.eup %1809  ;;  %1406 = vst [vmem:[%s2047_s5 + $0xe8] sm:$0xff] %v1374_v53  ;;  %1817 = vrcp.f32 %v2507_v57  ;;  %v1084_v0 = vand.u32 2147483647, %v2507_v57  ;;  %v1086_v10 = vand.u32 2147483648, %v2507_v57  ;;  %vm1080_vm6 = vweird.f32 %v2507_v57 }
 0x11b   : > { %v1812_v8 = vpop.eup %1811  ;;  %v963_v9 = vsel %vm962_vm4, %v1804_v58, %v959_v28  ;;  %1819 = vrcp.f32 %v2509_v54  ;;  %v2519_v36 = vadd.f32 1.0, %v1810_v5  ;;  %v1204_v3 = vand.u32 2147483647, %v2509_v54 }
 0x11c   : > { %v1814_v23 = vpop.eup %1813  ;;  %v968_v13 = vsel %vm965_vm5, %v967_v12, %v963_v9  ;;  %v2521_v15 = vadd.f32 1.0, %v1812_v8  ;;  %1821 = vpow2.f32 %v1650_v6  ;;  %v1206_v20 = vand.u32 2147483648, %v2509_v54 }
 0x11d   : > { %v1816_v61 = vpop.eup %1815  ;;  %v1351_v50 = vmul.f32 %v968_v13, %v2346_v44  ;;  %1823 = vrcp.f32 %v2519_v36  ;;  %v2526_v31 = vadd.f32 1.0, %v1814_v23  ;;  %vm2535_vm7 = vcmp.eq.f32.partialorder %v1084_v0, 8.507059e+37 }
 0x11e   : > { %1825 = vrcp.f32 %v2521_v15  ;;  %v2531_v44 = vadd.f32 1.0, %v1816_v61  ;;  %vm1200_vm8 = vweird.f32 %v2509_v54  ;;  %v1087_v14 = vor.u32 1.1754944e-38, %v1086_v10 }
 0x11f   : > { %1383 = vst [vmem:[%s2047_s5 + $0x30] sm:$0xff] %v1351_v50  ;;  %v1324_v29 = vand.u32 2147483647, %v2519_v36  ;;  %v1326_v55 = vand.u32 2147483648, %v2519_v36  ;;  %v979_v24 = vand.u32 2147483647, %v2521_v15  ;;  %1827 = vrcp.f32 %v2526_v31 }
 0x120   : > { %v1818_v19 = vpop.eup %1817  ;;  %v981_v18 = vand.u32 2147483648, %v2521_v15  ;;  %vm2546_vm9 = vcmp.eq.f32.partialorder %v1204_v3, 8.507059e+37  ;;  %v1207_v17 = vor.u32 1.1754944e-38, %v1206_v20  ;;  %1829 = vrcp.f32 %v2531_v44 }
 0x121   : > { %v1820_v21 = vpop.eup %1819  ;;  %v1076_v22 = vmul.f32 %v1818_v19, %v2507_v57  ;;  %vm1081_vm10 = vweird.f32 %v1818_v19  ;;  %vm1320_vm11 = vweird.f32 %v2519_v36  ;;  %vm975_vm12 = vweird.f32 %v2521_v15 }
 0x122   : > { %v1196_v27 = vmul.f32 %v1820_v21, %v2509_v54  ;;  %v1822_v34 = vpop.eup %1821  ;;  %vm1201_vm13 = vweird.f32 %v1820_v21  ;;  %vm2554_vm14 = vcmp.eq.f32.partialorder %v1324_v29, 8.507059e+37  ;;  %v1327_v16 = vor.u32 1.1754944e-38, %v1326_v55  ;;  %vm1082_vm0 = vmor %vm1080_vm6, %vm1081_vm10 }
 0x123   : > { %v1077_v30 = vsub.f32 1.0, %v1076_v22  ;;  %v1824_v41 = vpop.eup %1823  ;;  %vm2559_vm15 = vcmp.eq.f32.partialorder %v979_v24, 8.507059e+37  ;;  %v982_v33 = vor.u32 1.1754944e-38, %v981_v18  ;;  %vm1095_vm1 = vweird.f32 %v2526_v31  ;;  %vm1202_vm2 = vmor %vm1200_vm8, %vm1201_vm13 }
 0x124   : > { %v1197_v39 = vsub.f32 1.0, %v1196_v27  ;;  %v1826_v4 = vpop.eup %1825  ;;  %v1316_v45 = vmul.f32 %v1824_v41, %v2519_v36  ;;  %v1099_v25 = vand.u32 2147483647, %v2526_v31  ;;  %vm1321_vm3 = vweird.f32 %v1824_v41 }
 0x125   : > { %v1078_v58 = vmul.f32 %v1818_v19, %v1077_v30  ;;  %v971_v37 = vmul.f32 %v1826_v4, %v2521_v15  ;;  %v1828_v32 = vpop.eup %1827  ;;  %v2570_v1 = vadd.f32 1.0, %v1822_v34  ;;  %vm976_vm4 = vweird.f32 %v1826_v4  ;;  %vm1322_vm5 = vmor %vm1320_vm11, %vm1321_vm3 }
 0x126   : > { %v1198_v43 = vmul.f32 %v1820_v21, %v1197_v39  ;;  %v1317_v59 = vsub.f32 1.0, %v1316_v45  ;;  %v1830_v2 = vpop.eup %1829  ;;  %v1091_v57 = vmul.f32 %v1828_v32, %v2526_v31  ;;  %v1101_v13 = vand.u32 2147483648, %v2526_v31  ;;  %vm977_vm6 = vmor %vm975_vm12, %vm976_vm4 }
 0x127   : > { %v1079_v51 = vadd.f32 %v1818_v19, %v1078_v58  ;;  %v972_v63 = vsub.f32 1.0, %v971_v37  ;;  %v1211_v9 = vmul.f32 %v1830_v2, %v2531_v44  ;;  %1831 = vrcp.f32 %v2570_v1 }
 0x128   : > { %v1199_v56 = vadd.f32 %v1820_v21, %v1198_v43  ;;  %v1318_v53 = vmul.f32 %v1824_v41, %v1317_v59  ;;  %v1092_v8 = vsub.f32 1.0, %v1091_v57  ;;  %vm1216_vm8 = vweird.f32 %v1830_v2 }
 0x129   : > { %v1083_v26 = vsel %vm1082_vm0, %v1818_v19, %v1079_v51  ;;  %v973_v5 = vmul.f32 %v1826_v4, %v972_v63  ;;  %v1212_v50 = vsub.f32 1.0, %v1211_v9  ;;  %v1221_v10 = vand.u32 2147483648, %v2531_v44 }
 0x12a   : > { %v1088_v35 = vsel %vm2535_vm7, %v1087_v14, %v1083_v26  ;;  %v1203_v46 = vsel %vm1202_vm2, %v1820_v21, %v1199_v56  ;;  %v1319_v6 = vadd.f32 %v1824_v41, %v1318_v53  ;;  %vm1096_vm7 = vweird.f32 %v1828_v32 }
 0x12b   : > { %v1359_v28 = vmul.f32 %v1088_v35, %v2375_v7  ;;  %v1208_v54 = vsel %vm2546_vm9, %v1207_v17, %v1203_v46  ;;  %v974_v23 = vadd.f32 %v1826_v4, %v973_v5  ;;  %v1219_v7 = vand.u32 2147483647, %v2531_v44  ;;  %vm1097_vm9 = vmor %vm1095_vm1, %vm1096_vm7 }
 0x12c   : > { %v1367_v12 = vmul.f32 %v1208_v54, %v2381_v60  ;;  %v1323_v61 = vsel %vm1322_vm5, %v1824_v41, %v1319_v6  ;;  %v1093_v60 = vmul.f32 %v1828_v32, %v1092_v8  ;;  %v1213_v15 = vmul.f32 %v1830_v2, %v1212_v50 }
 0x12d   : > { %1391 = vst [vmem:[%s2047_s5 + $0x70] sm:$0xff] %v1359_v28  ;;  %v1328_v0 = vsel %vm2554_vm14, %v1327_v16, %v1323_v61  ;;  %v978_v36 = vsel %vm977_vm6, %v1826_v4, %v974_v23  ;;  %v1102_v22 = vor.u32 1.1754944e-38, %v1101_v13  ;;  %vm1100_vm10 = vcmp.eq.f32.partialorder %v1099_v25, 8.507059e+37 }
 0x12e   : > { %1399 = vst [vmem:[%s2047_s5 + $0xb0] sm:$0xff] %v1367_v12  ;;  %v1375_v19 = vmul.f32 %v1328_v0, %v2475_v42  ;;  %v983_v3 = vsel %vm2559_vm15, %v982_v33, %v978_v36  ;;  %v1094_v20 = vadd.f32 %v1828_v32, %v1093_v60  ;;  %v1214_v14 = vadd.f32 %v1830_v2, %v1213_v15  ;;  %v1832_v42 = vpop.eup %1831 }
 0x12f   : > { %v1352_v21 = vmul.f32 %v983_v3, %v2481_v62  ;;  %vm1215_vm11 = vweird.f32 %v2531_v44  ;;  %v1222_v29 = vor.u32 1.1754944e-38, %v1221_v10  ;;  %vm1220_vm13 = vcmp.eq.f32.partialorder %v1219_v7, 8.507059e+37 }
 0x130   : > { %1407 = vst [vmem:[%s2047_s5 + $0xf0] sm:$0xff] %v1375_v19  ;;  %v1098_v11 = vsel %vm1097_vm9, %v1828_v32, %v1094_v20  ;;  %vm1217_vm12 = vmor %vm1215_vm11, %vm1216_vm8  ;;  %v1331_v31 = vmul.f32 %v1832_v42, %v2570_v1  ;;  %v1341_v44 = vand.u32 2147483648, %v2570_v1  ;;  %vm1336_vm14 = vweird.f32 %v1832_v42 }
 0x131   : > { %1384 = vst [vmem:[%s2047_s5 + $0x38] sm:$0xff] %v1352_v21  ;;  %v1103_v27 = vsel %vm1100_vm10, %v1102_v22, %v1098_v11  ;;  %v1218_v55 = vsel %vm1217_vm12, %v1830_v2, %v1214_v14  ;;  %v1339_v39 = vand.u32 2147483647, %v2570_v1  ;;  %vm1335_vm15 = vweird.f32 %v2570_v1 }
 0x132   : > { %v1360_v62 = vmul.f32 %v1103_v27, %v2483_v48  ;;  %v1223_v30 = vsel %vm1220_vm13, %v1222_v29, %v1218_v55  ;;  %v1332_v18 = vsub.f32 1.0, %v1331_v31  ;;  %vm1337_vm0 = vmor %vm1335_vm15, %vm1336_vm14  ;;  %v1342_v48 = vor.u32 1.1754944e-38, %v1341_v44 }
 0x133   : > { %v1368_v24 = vmul.f32 %v1223_v30, %v2485_v38  ;;  %vm1340_vm1 = vcmp.eq.f32.partialorder %v1339_v39, 8.507059e+37 }
 0x134   : > { %1392 = vst [vmem:[%s2047_s5 + $0x78] sm:$0xff] %v1360_v62  ;;  %v1333_v34 = vmul.f32 %v1832_v42, %v1332_v18 }
 0x135   : > { %1400 = vst [vmem:[%s2047_s5 + $0xb8] sm:$0xff] %v1368_v24 }
 0x136   : > { %v1334_v40 = vadd.f32 %v1832_v42, %v1333_v34 }
 0x138   : > { %v1338_v17 = vsel %vm1337_vm0, %v1832_v42, %v1334_v40 }
 0x139   : > { %v1343_v41 = vsel %vm1340_vm1, %v1342_v48, %v1338_v17 }
 0x13a   : > { %v1376_v58 = vmul.f32 %v1343_v41, %v2502_v47 }
 0x13c   : > { %1408 = vst [vmem:[%s2047_s5 + $0xf8] sm:$0xff] %v1376_v58 }
 0x13d PF: > { %s13_s14 = sadd.s32 1, %s1856_s14   ;;  %s2680_s12 = smov %s1852_s13 }
 0x13e   : > { %p10_p5 = scmp.ge.s32.totalorder %s13_s14, 4   ;;  %s2681_s13 = smov %s2683_s15 }
 0x140   :  { %12 = sbr.rel (!%p10_p5) target bundleno = 2 (0x2), region = 76 }

</bundles_post_ra>
